<compile_context>
chip_gen: v5e
topology: v5e:2x2
jax: 0.10.0
libtpu: 0.0.40
codegen_flags: <defaults>
</compile_context>

<pallas_src>
import functools

import jax
import jax.numpy as jnp
from jax.experimental import pallas as pl
from jax.experimental.pallas import tpu as pltpu

IGNORE_INDEX = 255
_LANE = 128


def _ce2d_kernel(logits_ref, targets_ref, sum_out_ref, cnt_out_ref,
                 sum_acc, cnt_acc, *, hw, tm, has_tail):
    j = pl.program_id(1)
    last_j = pl.num_programs(1) - 1

    @pl.when(j == 0)
    def _init():
        sum_acc[...] = jnp.zeros_like(sum_acc)
        cnt_acc[...] = jnp.zeros_like(cnt_acc)

    x = logits_ref[0].astype(jnp.float32)   # (C, tm): classes on sublanes, pixels on lanes
    t = targets_ref[0].astype(jnp.int32)    # (1, tm) (int16 in HBM for small C)

    # numerically stable log-sum-exp over the class (sublane) axis
    m = jnp.max(x, axis=0, keepdims=True)                             # (1, tm)
    shifted = x - m
    lse = jnp.log(jnp.sum(jnp.exp(shifted), axis=0, keepdims=True))   # (1, tm)

    # gather shifted[target] via compare+select (C small; VPU only, no MXU).
    # -logp[target] = lse - shifted[target]  (no (C, tm) logp materialization)
    cls = jax.lax.broadcasted_iota(jnp.int32, x.shape, 0)             # (C, tm)
    picked_shifted = jnp.sum(jnp.where(cls == t, shifted, 0.0),
                             axis=0, keepdims=True)                   # (1, tm)

    valid = t != IGNORE_INDEX                                         # (1, tm)
    # jnp.where (select, not multiply) so garbage lanes can never leak NaN/inf
    contrib = jnp.where(valid, lse - picked_shifted, 0.0)             # (1, tm)
    ones = jnp.where(valid, 1.0, 0.0)                                 # (1, tm)

    if has_tail:
        # ragged tail exists: only the last pixel tile pays for the iota mask
        @pl.when(j < last_j)
        def _acc_full():
            sum_acc[...] += contrib
            cnt_acc[...] += ones

        @pl.when(j == last_j)
        def _acc_tail():
            col = j * tm + jax.lax.broadcasted_iota(jnp.int32, (1, tm), 1)
            in_range = col < hw
            sum_acc[...] += jnp.where(in_range, contrib, 0.0)
            cnt_acc[...] += jnp.where(in_range, ones, 0.0)
    else:
        sum_acc[...] += contrib
        cnt_acc[...] += ones

    @pl.when(j == last_j)
    def _finalize():
        # one cross-lane reduce per batch element; lane-dense (1, 128) output
        s = jnp.sum(sum_acc[...], axis=1, keepdims=True)   # (1, 1)
        c = jnp.sum(cnt_acc[...], axis=1, keepdims=True)   # (1, 1)
        sum_out_ref[0] = jnp.broadcast_to(s, (1, _LANE))
        cnt_out_ref[0] = jnp.broadcast_to(c, (1, _LANE))


def _vmem_budget_bytes():
    """(double-buffered footprint budget, logits-block byte target) per generation."""
    kind = ""
    try:
        kind = jax.devices()[0].device_kind.lower()
    except Exception:
        pass
    if ("v5 lite" in kind) or ("v5e" in kind) or ("v5lite" in kind):
        # v5e: 16 MiB default scoped VMEM, ~0.82 TB/s HBM -> smaller tiles suffice
        return 8 << 20, 2 << 20
    # v6e (32/128 MiB) and v7x (32/64 MiB) and unknown: conservative everywhere
    return 12 << 20, 4 << 20


def cross_entropy_loss_2d(logits_nchw, targets_nhw, *, tm=None, logits_buffers=None):
    """Matches torch CrossEntropyLoss2d(weight=None, size_average=True, ignore_index=255)."""
    N, C, H, W = logits_nchw.shape
    HW = H * W

    bx = jnp.dtype(logits_nchw.dtype).itemsize          # bf16 accepted as-is (no upcast)
    tgt_dtype = jnp.int16 if C <= 32 else jnp.int32     # 255 fits in int16
    bt = jnp.dtype(tgt_dtype).itemsize

    # Free reshapes only (no transpose, no pad): channels stay contiguous-major,
    # pixels become the last (lane) axis.
    x = logits_nchw.reshape(N, C, HW)
    t = targets_nhw.reshape(N, 1, HW).astype(tgt_dtype)

    # ---- tile selection: scale pixel tile with C, bounded by a VMEM budget ----
    budget, block_target = _vmem_budget_bytes()
    if tm is None:
        per_lane = 2 * (C * bx + bt) + 2 * 4             # dbl-buffered inputs + 2 f32 acc
        tm_vmem = budget // per_lane
        tm_blk = block_target // max(1, C * bx)          # ~2-4 MiB logits block
        tm = max(_LANE, (min(tm_vmem, tm_blk) // _LANE) * _LANE)

    if HW <= tm:
        tm_eff = HW                                      # full extent is always legal
    else:
        tm_eff = max(_LANE, (tm // _LANE) * _LANE)

    grid = (N, pl.cdiv(HW, tm_eff))
    has_tail = (HW % tm_eff) != 0

    footprint = tm_eff * (2 * (C * bx + bt) + 2 * 4) + 2 * N * _LANE * 4
    vmem_limit = int(min(32 << 20, max(16 << 20, 2 * footprint)))

    kernel = functools.partial(_ce2d_kernel, hw=HW, tm=tm_eff, has_tail=has_tail)

    logits_spec_args = ((1, C, tm_eff), lambda n, j: (n, 0, j))
    if logits_buffers is not None and logits_buffers != 2:
        # optional deeper pipelining of the dominant logits stream (sweep only if
        # xprof shows exposed DMA and VMEM headroom remains)
        logits_spec = pl.BlockSpec(*logits_spec_args,
                                   pipeline_mode=pl.Buffered(logits_buffers))
    else:
        logits_spec = pl.BlockSpec(*logits_spec_args)

    sums, cnts = pl.pallas_call(
        kernel,
        out_shape=(jax.ShapeDtypeStruct((N, 1, _LANE), jnp.float32),
                   jax.ShapeDtypeStruct((N, 1, _LANE), jnp.float32)),
        grid_spec=pltpu.PrefetchScalarGridSpec(
            num_scalar_prefetch=0,
            grid=grid,
            in_specs=[
                logits_spec,
                pl.BlockSpec((1, 1, tm_eff), lambda n, j: (n, 0, j)),
            ],
            out_specs=[
                pl.BlockSpec((1, 1, _LANE), lambda n, j: (n, 0, 0)),
                pl.BlockSpec((1, 1, _LANE), lambda n, j: (n, 0, 0)),
            ],
            scratch_shapes=[
                pltpu.VMEM((1, tm_eff), jnp.float32),   # per-lane partial -logp sums
                pltpu.VMEM((1, tm_eff), jnp.float32),   # per-lane valid counts
            ],
        ),
        compiler_params=pltpu.CompilerParams(
            # batch axis parallel -> v7x uses both TensorCores; per-batch partial
            # {sum, cnt} outputs keep this correct (no shared global accumulator).
            dimension_semantics=("parallel", "arbitrary"),
            vmem_limit_bytes=vmem_limit,
        ),
    )(x, t)

    total = jnp.sum(sums[:, 0, 0])
    count = jnp.sum(cnts[:, 0, 0])
    return total / count                                  # NaN if no valid pixel (matches torch)


def _reference(logits_nchw, targets_nhw):
    logp = jax.nn.log_softmax(logits_nchw.astype(jnp.float32), axis=1)
    logp = jnp.transpose(logp, (0, 2, 3, 1)).reshape(-1, logp.shape[1])
    t = targets_nhw.reshape(-1)
    valid = t != IGNORE_INDEX
    t_safe = jnp.where(valid, t, 0)
    picked = jnp.take_along_axis(logp, t_safe[:, None], axis=1)[:, 0]
    return jnp.sum(-picked * valid) / jnp.sum(valid)


if __name__ == "__main__":
    key = jax.random.PRNGKey(0)
    ks = jax.random.split(key, 9)

    # case 1: batch=2, channels=4, spatial=16x16, f32, auto tile (single full tile)
    N, C, H, W = 2, 4, 16, 16
    logits = jax.random.normal(ks[0], (N, C, H, W), dtype=jnp.float32)
    targets = jax.random.randint(ks[1], (N, H, W), 0, C, dtype=jnp.int32)
    targets = jnp.where(jax.random.uniform(ks[2], (N, H, W)) < 0.1, IGNORE_INDEX, targets)
    loss = jax.block_until_ready(cross_entropy_loss_2d(logits, targets))
    ref = _reference(logits, targets)
    assert jnp.allclose(loss, ref, rtol=1e-5, atol=1e-5), (loss, ref)

    # case 2: ragged tail (HW=130, tm=128 forced) -> exercises last-tile mask + int16 targets
    N2, C2, H2, W2 = 2, 3, 10, 13
    logits2 = jax.random.normal(ks[3], (N2, C2, H2, W2), dtype=jnp.float32)
    targets2 = jax.random.randint(ks[4], (N2, H2, W2), 0, C2, dtype=jnp.int32)
    targets2 = jnp.where(jax.random.uniform(ks[5], (N2, H2, W2)) < 0.1, IGNORE_INDEX, targets2)
    loss2 = jax.block_until_ready(cross_entropy_loss_2d(logits2, targets2, tm=128))
    ref2 = _reference(logits2, targets2)
    assert jnp.allclose(loss2, ref2, rtol=1e-5, atol=1e-5), (loss2, ref2)

    # case 3: multi-tile, no tail (HW % tm == 0) -> exercises the mask-free accumulate path
    N3, C3, H3, W3 = 2, 4, 32, 32
    logits3 = jax.random.normal(ks[6], (N3, C3, H3, W3), dtype=jnp.float32)
    targets3 = jax.random.randint(ks[7], (N3, H3, W3), 0, C3, dtype=jnp.int32)
    targets3 = jnp.where(jax.random.uniform(ks[8], (N3, H3, W3)) < 0.1, IGNORE_INDEX, targets3)
    loss3 = jax.block_until_ready(cross_entropy_loss_2d(logits3, targets3, tm=256))
    ref3 = _reference(logits3, targets3)
    assert jnp.allclose(loss3, ref3, rtol=1e-4, atol=1e-5), (loss3, ref3)

    # case 4: bf16 logits stream (no wrapper upcast; f32 math stays in-kernel)
    logits_bf16 = logits.astype(jnp.bfloat16)
    loss4 = jax.block_until_ready(cross_entropy_loss_2d(logits_bf16, targets))
    ref4 = _reference(logits_bf16, targets)
    assert jnp.allclose(loss4, ref4, rtol=1e-3, atol=1e-3), (loss4, ref4)

    print("KERNEL_OK")
</pallas_src>

<mosaic_0001>
module attributes {stable_mosaic.version = 11 : i64} {
  func.func @_ce2d_kernel(%arg0: i32, %arg1: i32, %arg2: memref<1x4x256xf32, #tpu.memory_space<vmem>>, %arg3: memref<1x1x256xi16, #tpu.memory_space<vmem>>, %arg4: memref<1x1x128xf32, #tpu.memory_space<vmem>>, %arg5: memref<1x1x128xf32, #tpu.memory_space<vmem>>, %arg6: memref<1x256xf32, #tpu.memory_space<vmem>>, %arg7: memref<1x256xf32, #tpu.memory_space<vmem>>) attributes {dimension_semantics = [#tpu.dimension_semantics<parallel>, #tpu.dimension_semantics<arbitrary>], iteration_bounds = array<i64: 2, 1>, scalar_prefetch = 0 : i64, scratch_operands = 2 : i64, tpu.core_type = #tpu.core_type<tc>, window_params = [{transform_indices = @transform_0, window_bounds = array<i64: 1, 4, 256>}, {transform_indices = @transform_1, window_bounds = array<i64: 1, 1, 256>}, {transform_indices = @transform_2, window_bounds = array<i64: 1, 1, 128>}, {transform_indices = @transform_3, window_bounds = array<i64: 1, 1, 128>}]} {
    %c0_i32 = arith.constant 0 : i32
    %0 = arith.cmpi eq, %arg1, %c0_i32 : i32
    %1 = arith.extui %0 : i1 to i32
    %c0_i32_0 = arith.constant 0 : i32
    %2 = arith.cmpi ne, %1, %c0_i32_0 : i32
    scf.if %2 {
      %cst_22 = arith.constant 0.000000e+00 : f32
      %40 = vector.broadcast %cst_22 : f32 to vector<1x256xf32>
      %c0_23 = arith.constant 0 : index
      %c0_24 = arith.constant 0 : index
      %41 = vector.load %arg6[%c0_23, %c0_24] : memref<1x256xf32, #tpu.memory_space<vmem>>, vector<1x256xf32>
      tpu.vector_store %arg6[%c0_23, %c0_24], %40 {strides = array<i32>} : memref<1x256xf32, #tpu.memory_space<vmem>>, vector<1x256xf32>,
      %cst_25 = arith.constant 0.000000e+00 : f32
      %42 = vector.broadcast %cst_25 : f32 to vector<1x256xf32>
      %c0_26 = arith.constant 0 : index
      %c0_27 = arith.constant 0 : index
      %43 = vector.load %arg7[%c0_26, %c0_27] : memref<1x256xf32, #tpu.memory_space<vmem>>, vector<1x256xf32>
      tpu.vector_store %arg7[%c0_26, %c0_27], %42 {strides = array<i32>} : memref<1x256xf32, #tpu.memory_space<vmem>>, vector<1x256xf32>,
    } else {
    }
    %c0 = arith.constant 0 : index
    %c0_1 = arith.constant 0 : index
    %c0_2 = arith.constant 0 : index
    %3 = vector.load %arg2[%c0, %c0_1, %c0_2] : memref<1x4x256xf32, #tpu.memory_space<vmem>>, vector<1x4x256xf32>
    %4 = vector.shape_cast %3 : vector<1x4x256xf32> to vector<4x256xf32>
    %c0_3 = arith.constant 0 : index
    %c0_4 = arith.constant 0 : index
    %c0_5 = arith.constant 0 : index
    %5 = vector.load %arg3[%c0_3, %c0_4, %c0_5] : memref<1x1x256xi16, #tpu.memory_space<vmem>>, vector<1x1x256xi16>
    %6 = vector.shape_cast %5 : vector<1x1x256xi16> to vector<1x256xi16>
    %7 = arith.extsi %6 : vector<1x256xi16> to vector<1x256xi32>
    %cst = arith.constant dense<0xFF800000> : vector<256xf32>
    %8 = vector.multi_reduction <maximumf>, %4, %cst [0] : vector<4x256xf32> to vector<256xf32>
    %9 = vector.shape_cast %8 : vector<256xf32> to vector<1x256xf32>
    %10 = vector.broadcast %9 : vector<1x256xf32> to vector<4x256xf32>
    %11 = arith.subf %4, %10 : vector<4x256xf32>
    %12 = math.exp %11 : vector<4x256xf32>
    %cst_6 = arith.constant dense<0.000000e+00> : vector<256xf32>
    %13 = vector.multi_reduction <add>, %12, %cst_6 [0] : vector<4x256xf32> to vector<256xf32>
    %14 = vector.shape_cast %13 : vector<256xf32> to vector<1x256xf32>
    %15 = math.log %14 : vector<1x256xf32>
    %16 = tpu.iota {dimensions = array<i32: 0>} : vector<4x256xi32>
    %17 = vector.broadcast %7 : vector<1x256xi32> to vector<4x256xi32>
    %18 = arith.cmpi eq, %16, %17 : vector<4x256xi32>
    %cst_7 = arith.constant 0.000000e+00 : f32
    %19 = vector.broadcast %cst_7 : f32 to vector<4x256xf32>
    %20 = arith.select %18, %11, %19 : vector<4x256xi1>, vector<4x256xf32>
    %cst_8 = arith.constant dense<0.000000e+00> : vector<256xf32>
    %21 = vector.multi_reduction <add>, %20, %cst_8 [0] : vector<4x256xf32> to vector<256xf32>
    %22 = vector.shape_cast %21 : vector<256xf32> to vector<1x256xf32>
    %c255_i32 = arith.constant 255 : i32
    %23 = vector.broadcast %c255_i32 : i32 to vector<1x256xi32>
    %24 = arith.cmpi ne, %7, %23 : vector<1x256xi32>
    %25 = arith.subf %15, %22 : vector<1x256xf32>
    %cst_9 = arith.constant 0.000000e+00 : f32
    %26 = vector.broadcast %cst_9 : f32 to vector<1x256xf32>
    %27 = arith.select %24, %25, %26 : vector<1x256xi1>, vector<1x256xf32>
    %cst_10 = arith.constant 1.000000e+00 : f32
    %cst_11 = arith.constant 0.000000e+00 : f32
    %28 = vector.broadcast %cst_10 : f32 to vector<1x256xf32>
    %29 = vector.broadcast %cst_11 : f32 to vector<1x256xf32>
    %30 = arith.select %24, %28, %29 : vector<1x256xi1>, vector<1x256xf32>
    %c0_12 = arith.constant 0 : index
    %c0_13 = arith.constant 0 : index
    %31 = vector.load %arg6[%c0_12, %c0_13] : memref<1x256xf32, #tpu.memory_space<vmem>>, vector<1x256xf32>
    %32 = arith.addf %31, %27 : vector<1x256xf32>
    %c0_14 = arith.constant 0 : index
    %c0_15 = arith.constant 0 : index
    %33 = vector.load %arg6[%c0_14, %c0_15] : memref<1x256xf32, #tpu.memory_space<vmem>>, vector<1x256xf32>
    tpu.vector_store %arg6[%c0_14, %c0_15], %32 {strides = array<i32>} : memref<1x256xf32, #tpu.memory_space<vmem>>, vector<1x256xf32>,
    %c0_16 = arith.constant 0 : index
    %c0_17 = arith.constant 0 : index
    %34 = vector.load %arg7[%c0_16, %c0_17] : memref<1x256xf32, #tpu.memory_space<vmem>>, vector<1x256xf32>
    %35 = arith.addf %34, %30 : vector<1x256xf32>
    %c0_18 = arith.constant 0 : index
    %c0_19 = arith.constant 0 : index
    %36 = vector.load %arg7[%c0_18, %c0_19] : memref<1x256xf32, #tpu.memory_space<vmem>>, vector<1x256xf32>
    tpu.vector_store %arg7[%c0_18, %c0_19], %35 {strides = array<i32>} : memref<1x256xf32, #tpu.memory_space<vmem>>, vector<1x256xf32>,
    %c0_i32_20 = arith.constant 0 : i32
    %37 = arith.cmpi eq, %arg1, %c0_i32_20 : i32
    %38 = arith.extui %37 : i1 to i32
    %c0_i32_21 = arith.constant 0 : i32
    %39 = arith.cmpi ne, %38, %c0_i32_21 : i32
    scf.if %39 {
      %c0_22 = arith.constant 0 : index
      %c0_23 = arith.constant 0 : index
      %40 = vector.load %arg6[%c0_22, %c0_23] : memref<1x256xf32, #tpu.memory_space<vmem>>, vector<1x256xf32>
      %cst_24 = arith.constant dense<0.000000e+00> : vector<1xf32>
      %41 = vector.multi_reduction <add>, %40, %cst_24 [1] : vector<1x256xf32> to vector<1xf32>
      %42 = vector.shape_cast %41 : vector<1xf32> to vector<1x1xf32>
      %c0_25 = arith.constant 0 : index
      %c0_26 = arith.constant 0 : index
      %43 = vector.load %arg7[%c0_25, %c0_26] : memref<1x256xf32, #tpu.memory_space<vmem>>, vector<1x256xf32>
      %cst_27 = arith.constant dense<0.000000e+00> : vector<1xf32>
      %44 = vector.multi_reduction <add>, %43, %cst_27 [1] : vector<1x256xf32> to vector<1xf32>
      %45 = vector.shape_cast %44 : vector<1xf32> to vector<1x1xf32>
      %46 = vector.shape_cast %42 : vector<1x1xf32> to vector<1x1xf32>
      %47 = vector.broadcast %46 : vector<1x1xf32> to vector<1x128xf32>
      %c0_28 = arith.constant 0 : index
      %c0_29 = arith.constant 0 : index
      %c0_30 = arith.constant 0 : index
      %48 = vector.load %arg4[%c0_28, %c0_29, %c0_30] : memref<1x1x128xf32, #tpu.memory_space<vmem>>, vector<1x1x128xf32>
      %49 = vector.shape_cast %48 : vector<1x1x128xf32> to vector<1x128xf32>
      %50 = vector.shape_cast %47 : vector<1x128xf32> to vector<1x1x128xf32>
      tpu.vector_store %arg4[%c0_28, %c0_29, %c0_30], %50 {strides = array<i32>} : memref<1x1x128xf32, #tpu.memory_space<vmem>>, vector<1x1x128xf32>,
      %51 = vector.shape_cast %45 : vector<1x1xf32> to vector<1x1xf32>
      %52 = vector.broadcast %51 : vector<1x1xf32> to vector<1x128xf32>
      %c0_31 = arith.constant 0 : index
      %c0_32 = arith.constant 0 : index
      %c0_33 = arith.constant 0 : index
      %53 = vector.load %arg5[%c0_31, %c0_32, %c0_33] : memref<1x1x128xf32, #tpu.memory_space<vmem>>, vector<1x1x128xf32>
      %54 = vector.shape_cast %53 : vector<1x1x128xf32> to vector<1x128xf32>
      %55 = vector.shape_cast %52 : vector<1x128xf32> to vector<1x1x128xf32>
      tpu.vector_store %arg5[%c0_31, %c0_32, %c0_33], %55 {strides = array<i32>} : memref<1x1x128xf32, #tpu.memory_space<vmem>>, vector<1x1x128xf32>,
    } else {
    }
    return
  }
  func.func @transform_0(%arg0: i32, %arg1: i32) -> (i32, i32, i32) {
    %c0_i32 = arith.constant 0 : i32
    %c0_i32_0 = arith.constant 0 : i32
    return %arg0, %c0_i32, %arg1 : i32, i32, i32
  }
  func.func @transform_1(%arg0: i32, %arg1: i32) -> (i32, i32, i32) {
    %c0_i32 = arith.constant 0 : i32
    %c0_i32_0 = arith.constant 0 : i32
    return %arg0, %c0_i32, %arg1 : i32, i32, i32
  }
  func.func @transform_2(%arg0: i32, %arg1: i32) -> (i32, i32, i32) {
    %c0_i32 = arith.constant 0 : i32
    %c0_i32_0 = arith.constant 0 : i32
    %c0_i32_1 = arith.constant 0 : i32
    return %arg0, %c0_i32, %c0_i32_0 : i32, i32, i32
  }
  func.func @transform_3(%arg0: i32, %arg1: i32) -> (i32, i32, i32) {
    %c0_i32 = arith.constant 0 : i32
    %c0_i32_0 = arith.constant 0 : i32
    %c0_i32_1 = arith.constant 0 : i32
    return %arg0, %c0_i32, %c0_i32_0 : i32, i32, i32
  }
}

</mosaic_0001>

<bundles_post_ra>
// kernel: tpu_custom_call.1
= control target key start
LH: loop header
LB: loop body
LE: loop exit
PB: predicated region body
PF: predicated region fallthrough
CT: control target
= control target key end

     0   :  { %9 = vsyncpa [#allocation5], 0  ;;  %s997_s0 = inlined_call_operand.hbm [shape: f32[2,4,256], index: 0, kind: input, shape index: {}]   ;;  %s998_s1 = inlined_call_operand.vmem [shape: s16[2,1,256], index: 1, kind: input, shape index: {}]   ;;  %s999_s2 = inlined_call_operand.hbm [shape: f32[2,1,128], index: 2, kind: output, shape index: {0}]   ;;  %s1000_s3 = inlined_call_operand.hbm [shape: f32[2,1,128], index: 3, kind: output, shape index: {1}]  }
   0x1   :  { %11 = vsyncpa [#allocation5 + $0x1], 0 }
   0x2   :  { %12 = vsyncpa [#allocation6], 0 }
   0x3   :  { %14 = vsyncpa [#allocation6 + $0x1], 0 }
   0x4   :  { %15 = vsyncpa [#allocation9], 0 }
   0x5   :  { %17 = vsyncpa [#allocation9 + $0x1], 0  ;;  %s814_s12 = smov 0   ;;  %s816_s13 = smov 0  }
   0x6   :  { %s818_s14 = smov 0   ;;  %s820_s15 = smov 0  }
   0x7   :  { %s822_s16 = smov 0   ;;  %s824_s17 = smov 0  }
   0x8 LB: > { %s560_s18 = sadd.s32 4294967295, %s791_s17   ;;  %s561_s19 = sadd.s32 4294967294, %s791_s17   ;;  %s791_s17 = sphi %s824_s17, %s23_s17   ;;  %s787_s16 = sphi %s822_s16, %s1011_s16   ;;  %s783_s15 = sphi %s820_s15, %s1010_s15   ;;  %s779_s14 = sphi %s818_s14, %s1009_s14   ;;  %s775_s13 = sphi %s816_s13, %s1008_s13   ;;  %s771_s12 = sphi %s814_s12, %s1007_s12  }
   0x9   : > { %s35_s20 = sadd.s32 1, %s787_s16  ;;  %s44_s21 = sadd.s32 1, %s779_s14 }
   0xa   : > { %p37_p0 = scmp.ge.s32.totalorder %s35_s20, 2  ;;  %p51_p1 = scmp.ne.s32.totalorder %s779_s14, %s775_s13 }
   0xb   : > { %p52_p2 = scmp.eq.s32.totalorder %s791_s17, 0  ;;  %p57_p3 = scmp.ne.s32.totalorder %s775_s13, %s771_s12 }
   0xc   : > { %s1013_s20 = smov (%p37_p0, %s35_s20), 0  ;;  %p58_p5 = scmp.eq.s32.totalorder %s560_s18, 0 }
   0xd   : > { %p855_p4 = por %p52_p2, %p51_p1  ;;  %s39_s23 = ssub.s32 %s787_s16, %s1013_s20 }
   0xe   : > { %p109_p6 = scmp.eq.s32.totalorder %s560_s18, 1  ;;  %p42_p7 = scmp.eq.s32.totalorder %s39_s23, 0 }
   0xf   : > { %p861_p8 = por %p58_p5, %p57_p3  ;;  %p115_p10 = scmp.eq.s32.totalorder %s561_s19, 1 }
  0x10   : > { %p865_p9 = por %p109_p6, %p51_p1  ;;  %p563_p12 = scmp.ge.s32.totalorder %s791_s17, 2 }
  0x11   : > { %s870_s26 = scalar_select %p42_p7, %s779_s14, %s44_s21  }
  0x12   : > { %p872_p11 = por %p115_p10, %p57_p3  ;;  %p590_p13 = scmp.lt.s32.totalorder %s791_s17, 2 }
  0x13   : > { %s161_s28 = sand.u32 1, %s779_s14   ;;  %s572_s30 = sshll.u32 %s787_s16, 3 }
  0x14   : > { %s564_s29 = sshll.u32 %s161_s28, 3  ;;  %s172_s6 = scalar_lea.hbm %s997_s0, %s572_s30 }
  0x15   : > { %s165_s7 = scalar_lea.vmem [#allocation4], %s564_s29  ;;  %s174_s9 = sshll.u32 %s172_s6, 4  ;;  %s175_s9 = int_to_ptr.hbm [resolvable:$true] %s174_s9 }
  0x16   : > { %s176_s8 = sshll.u32 %s165_s7, 4  ;;  %p580_p0 = pnand %p590_p13, %p855_p4  ;;  %s177_s8 = int_to_ptr.vmem [resolvable:$true] %s176_s8 }
  0x17   : > { %p567_p1 = scmp.ge.s32.totalorder %s791_s17, 1  ;;  %p193_p2 = scmp.lt.s32.totalorder %s791_s17, 3 }
  0x18   : > { %s162_s10 = scalar_lea.sflag [#allocation5], %s161_s28 }
  0x19   : > { %582 = dma.hbm_to_vmem [thread:$0]  (!%p580_p0), %s175_s9, 128, %s177_s8, %s162_s10  }
  0x1a   : > { %p194_p3 = pnand %p567_p1, %p193_p2 }
  0x1b   : > { %s888_s11 = sand.u32 (!%p194_p3), 1, %s775_s13  }
  0x1c   : > { %197 = sbr.rel (%p194_p3) target bundleno = 259 (0x103), region = 28  ;;  %s568_s18 = sshll.u32 (!%p194_p3), %s888_s11, 3 }
  0x1d   : > { %s200_s19 = scalar_lea.sflag (!%p194_p3), [#allocation5], %s888_s11  ;;  %s203_s21 = scalar_lea.vmem (!%p194_p3), [#allocation4], %s568_s18 }
  0x21   : > { %758 = dma.done.wait (%p861_p8), %s200_s19, 128  }
  0x22   : > { %760 = vsyncadd (%p861_p8), %s200_s19, 4294967168  ;;  %v252_v0 = vlaneseq  ;;  %v793_v2 = vmov 0.0   ;;  %v258_v3 = vld [vmem:[%s203_s21] sm:$0xff]  ;;  %vm267_vm1 = vcmask 1043456   ;;  %p240_p4 = scmp.lt.s32.totalorder %s783_s15, 1  ;;  %vm360_vm5 = vcmask 1040384   ;;  %s423_s5 = scalar_lea.hbm %s999_s2, %s783_s15 }
  0x23   : > { %262 = vst [vmem:[#allocation1] ss:$2 sm:$0xff] %v258_v3  ;;  %vm362_vm6 = vcmask 1042434   ;;  %vm350_vm7 = vcmask 1041408   ;;  %s231_s6 = scalar_lea.vmem [#allocation7], %s888_s11  ;;  %s427_s8 = sshll.u32 %s423_s5, 4  ;;  %s428_s8 = int_to_ptr.hbm [resolvable:$true] %s427_s8 }
  0x24   : > { %vm896_vm0 = vcmp.lt.s32.totalorder %v252_v0, 256  ;;  %s241_s22 = scalar_select %p240_p4, %s783_s15, 1  ;;  %v315_v29 = vshrl.u32 %v252_v0, 7 }
  0x25   : > { %256 = vst.msk [vmem:[#allocation2] sm:$0x3] %vm896_vm0, %v793_v2  ;;  %s425_s7 = sshll.u32 %s231_s6, 4  ;;  %s436_s18 = scalar_lea.hbm %s1000_s3, %s783_s15  ;;  %s426_s7 = int_to_ptr.vmem [resolvable:$true] %s425_s7 }
  0x26   : > { %257 = vst.msk [vmem:[#allocation3] sm:$0x3] %vm896_vm0, %v793_v2  ;;  %s569_s23 = sshll.u32 %s241_s22, 1  ;;  %s411_s19 = scalar_lea.sflag [#allocation6], %s888_s11 }
  0x27   : > { %s246_s29 = scalar_lea.vmem %s998_s1, %s569_s23  ;;  %s691_s21 = sshra.s32 %s428_s8, 4  ;;  %s692_s21 = int_to_ptr.hbm [resolvable:$true] %s691_s21 }
  0x28   : > { %v259_v24 = vld [vmem:[%s246_s29] sm:$0x3]  ;;  %s693_s22 = scalar_lea.hbm %s692_s21, 1  ;;  %s697_s28 = scalar_lea.hbm %s999_s2, 2 }
  0x29   : > { %v912_v25 = vunpack.c.l.b16 %v259_v24  ;;  %p694_p5 = scmp.ne.s32.totalorder %s692_s21, %s693_s22  ;;  %p698_p8 = scmp.lt.s32.totalorder %s692_s21, %s999_s2 }
  0x2a   : > { %v263_v4 = vld.sshfl [vmem:[#allocation1] sm:$0xff pattern:$0x75316420]  ;;  %v264_v5 = vld.sshfl [vmem:[#allocation1 + $0x8] sm:$0xff pattern:$0x75316420]  ;;  %p699_p10 = scmp.lt.s32.totalorder %s697_s28, %s693_s22 }
  0x2b   : > { %v268_v6 = vsel %vm267_vm1, %v263_v4, -inf  ;;  %v275_v7 = vsel %vm267_vm1, %v264_v5, -inf  ;;  %v317_v27 = vperm.slane %v912_v25, 2  ;;  %v316_v28 = vperm.slane %v912_v25, 0  ;;  %p695_p6 = pnand %p694_p5, %p865_p9 }
  0x2c   : > { %v269_v8 = vrot.slane %v268_v6, 4  ;;  %v276_v9 = vrot.slane %v275_v7, 4  ;;  %vm344_vm2 = vcmp.ne.s32.totalorder %v912_v25, 255  ;;  %v355_v24 = vld [vmem:[#allocation2] sm:$0x3]  ;;  %p700_p13 = por %p699_p10, %p698_p8 }
  0x2d   : > { %v319_v30 = vperm.slane %v317_v27, 0  ;;  %v318_v35 = vperm.slane %v316_v28, 0  ;;  %v354_v36 = vsel %vm344_vm2, 1.0, %v793_v2  ;;  %v372_v46 = vld [vmem:[#allocation3] sm:$0x3]  ;;  %p696_p7 = pneg %p695_p6 }
  0x2e   : > { %v270_v10 = vmax.f32 %v268_v6, %v269_v8  ;;  %v277_v11 = vmax.f32 %v275_v7, %v276_v9  ;;  %v374_v41 = vrot.slane %v354_v36, 1  ;;  %v375_v42 = vrot.slane %v354_v36, 2 }
  0x2f   : > { %vm320_vm3 = vcmp.eq.s32.totalorder %v315_v29, %v318_v35  ;;  %vm321_vm4 = vcmp.eq.s32.totalorder %v315_v29, %v319_v30  ;;  %v376_v43 = vrot.slane %v354_v36, 3  ;;  %p701_p0 = pnand %p700_p13, %p696_p7 }
  0x30   : > { %v271_v12 = vrot.slane %v270_v10, 2  ;;  %v278_v13 = vrot.slane %v277_v11, 2  ;;  %v377_v47 = vsel %vm360_vm5, %v354_v36, %v374_v41 }
  0x31   : > { %v378_v48 = vsel %vm362_vm6, %v375_v42, %v376_v43 }
  0x32   : > { %v272_v14 = vmax.f32 %v270_v10, %v271_v12  ;;  %v279_v15 = vmax.f32 %v277_v11, %v278_v13  ;;  %v379_v53 = vsel %vm350_vm7, %v377_v47, %v378_v48 }
  0x33   : > { %v381_v56 = vadd.f32 %v379_v53, %v372_v46 }
  0x34   : > { %v273_v16 = vrot.slane %v272_v14, 1  ;;  %v280_v17 = vrot.slane %v279_v15, 1 }
  0x35   : > { %382 = vst.msk [vmem:[#allocation3] sm:$0x3] %vm896_vm0, %v381_v56 }
  0x36   : > { %v274_v18 = vmax.f32 %v272_v14, %v273_v16  ;;  %v281_v19 = vmax.f32 %v279_v15, %v280_v17 }
  0x38   : > { %v284_v20 = vrot.slane %v281_v19, 4 }
  0x3a   : > { %v285_v21 = vsel %vm267_vm1, %v274_v18, %v284_v20 }
  0x3b   : > { %v287_v22 = vsub.f32 %v258_v3, %v285_v21 }
  0x3d   : > { %v288_v23 = vmul.f32 1.442695, %v287_v22 }
  0x3f   : > { %641 = vpow2.f32 %v288_v23 }
  0x45   : > { %v642_v26 = vpop.eup %641 }
  0x46   : > { %291 = vst [vmem:[#allocation1] ss:$2 sm:$0xff] %v642_v26 }
  0x4d   : > { %v292_v31 = vld.sshfl [vmem:[#allocation1] sm:$0xff pattern:$0x75316420]  ;;  %v293_v32 = vld.sshfl [vmem:[#allocation1 + $0x8] sm:$0xff pattern:$0x75316420] }
  0x4e   : > { %v296_v33 = vsel %vm267_vm1, %v292_v31, 0.0  ;;  %v303_v34 = vsel %vm267_vm1, %v293_v32, 0.0  ;;  %323 = vst [vmem:[#allocation1] ss:$2 sm:$0xff] %v287_v22  ;;  %v397_v31 = vld [vmem:[#allocation3] sm:$0x3] }
  0x4f   : > { %v297_v37 = vrot.slane %v296_v33, 4  ;;  %v304_v38 = vrot.slane %v303_v34, 4  ;;  %v399_v35 = vperm.slane %v397_v31, 0  ;;  %v400_v36 = vperm.slane %v397_v31, 1 }
  0x51   : > { %v298_v39 = vadd.f32 %v297_v37, %v296_v33  ;;  %v305_v40 = vadd.f32 %v304_v38, %v303_v34  ;;  %v403_v38 = vsel %vm360_vm5, %v399_v35, 0.0  ;;  %v404_v1 = vsel %vm360_vm5, %v400_v36, 0.0 }
  0x53   : > { %v299_v44 = vrot.slane %v298_v39, 2  ;;  %v306_v45 = vrot.slane %v305_v40, 2 }
  0x55   : > { %v300_v49 = vadd.f32 %v299_v44, %v298_v39  ;;  %v307_v50 = vadd.f32 %v306_v45, %v305_v40  ;;  %v324_v51 = vld.sshfl [vmem:[#allocation1] sm:$0xff pattern:$0x75316420]  ;;  %v325_v52 = vld.sshfl [vmem:[#allocation1 + $0x8] sm:$0xff pattern:$0x75316420]  ;;  %v405_v39 = vadd.f32 %v404_v1, %v403_v38 }
  0x56   : > { %v328_v54 = vsel %vm320_vm3, %v324_v51, 0.0  ;;  %v329_v55 = vsel %vm321_vm4, %v325_v52, 0.0 }
  0x57   : > { %v301_v57 = vrot.slane %v300_v49, 1  ;;  %v308_v58 = vrot.slane %v307_v50, 1  ;;  %v330_v59 = vsel %vm267_vm1, %v328_v54, 0.0  ;;  %v337_v60 = vsel %vm267_vm1, %v329_v55, 0.0 }
  0x58   : > { %v331_v61 = vrot.slane %v330_v59, 4  ;;  %v338_v62 = vrot.slane %v337_v60, 4 }
  0x59   : > { %v302_v63 = vadd.f32 %v301_v57, %v300_v49  ;;  %v309_v0 = vadd.f32 %v308_v58, %v307_v50 }
  0x5a   : > { %v332_v2 = vadd.f32 %v331_v61, %v330_v59  ;;  %v339_v3 = vadd.f32 %v338_v62, %v337_v60 }
  0x5b   : > { %643 = vlog2.f32 %v302_v63 }
  0x5c   : > { %645 = vlog2.f32 %v309_v0  ;;  %v333_v4 = vrot.slane %v332_v2, 2  ;;  %v340_v5 = vrot.slane %v339_v3, 2 }
  0x5e   : > { %v334_v6 = vadd.f32 %v333_v4, %v332_v2  ;;  %v341_v7 = vadd.f32 %v340_v5, %v339_v3 }
  0x60   : > { %v335_v8 = vrot.slane %v334_v6, 1  ;;  %v342_v9 = vrot.slane %v341_v7, 1 }
  0x61   : > { %v644_v10 = vpop.eup %643 }
  0x62   : > { %v646_v11 = vpop.eup %645  ;;  %v311_v12 = vmul.f32 0.6931472, %v644_v10  ;;  %v336_v13 = vadd.f32 %v335_v8, %v334_v6  ;;  %v343_v14 = vadd.f32 %v342_v9, %v341_v7 }
  0x63   : > { %v313_v15 = vmul.f32 0.6931472, %v646_v11 }
  0x64   : > { %v345_v16 = vsub.f32 %v311_v12, %v336_v13 }
  0x65   : > { %v346_v17 = vsub.f32 %v313_v15, %v343_v14 }
  0x67   : > { %v349_v18 = vrot.slane %v346_v17, 6 }
  0x69   : > { %v351_v19 = vsel %vm350_vm7, %v345_v16, %v349_v18 }
  0x6a   : > { %v353_v20 = vsel %vm344_vm2, %v351_v19, 0.0 }
  0x6b   : > { %v357_v21 = vrot.slane %v353_v20, 1  ;;  %v358_v22 = vrot.slane %v353_v20, 2  ;;  %v359_v23 = vrot.slane %v353_v20, 3 }
  0x6d   : > { %v361_v26 = vsel %vm360_vm5, %v353_v20, %v357_v21  ;;  %v363_v27 = vsel %vm362_vm6, %v358_v22, %v359_v23 }
  0x6e   : > { %v364_v28 = vsel %vm350_vm7, %v361_v26, %v363_v27 }
  0x6f   : > { %v366_v29 = vadd.f32 %v364_v28, %v355_v24 }
  0x71   : > { %371 = vst.msk [vmem:[#allocation2] sm:$0x3] %vm896_vm0, %v366_v29 }
  0x78   : > { %v386_v30 = vld [vmem:[#allocation2] sm:$0x3] }
  0x79   : > { %v388_v25 = vperm.slane %v386_v30, 0  ;;  %v389_v32 = vperm.slane %v386_v30, 1 }
  0x7b   : > { %v392_v33 = vsel %vm360_vm5, %v388_v25, 0.0  ;;  %v393_v34 = vsel %vm360_vm5, %v389_v32, 0.0 }
  0x7c   : > { %v394_v37 = vadd.f32 %v393_v34, %v392_v33 }
  0x7e   : > { %395 = vadd.xlane.f32.xlu0 %v394_v37 }
  0x86   : > { %406 = vadd.xlane.f32.xlu0 %v405_v39 }
  0xf1   : > { %v396_v40 = vpop.xlane.xlu0 %395 }
  0xf2   : > { %408 = vst [vmem:[%s231_s6] sm:$0x1] %v396_v40 }
  0xf3   : > { %704 = shalt.err (!%p701_p0)
}
  0xf4   : > { %575 = dma.vmem_to_hbm [thread:$0]  (%p865_p9), %s426_s7, 16, %s428_s8, %s411_s19  }
  0xf5   : > { %s237_s15 = scalar_lea.vmem [#allocation8], %s888_s11  ;;  %s440_s5 = sshll.u32 %s436_s18, 4  ;;  %s441_s5 = int_to_ptr.hbm [resolvable:$true] %s440_s5 }
  0xf6   : > { %s438_s4 = sshll.u32 %s237_s15, 4  ;;  %s415_s6 = scalar_lea.sflag [#allocation9], %s888_s11  ;;  %s439_s4 = int_to_ptr.vmem [resolvable:$true] %s438_s4 }
  0xf7   : > { %s719_s9 = sshra.s32 %s441_s5, 4  ;;  %s725_s23 = scalar_lea.hbm %s1000_s3, 2  ;;  %s720_s9 = int_to_ptr.hbm [resolvable:$true] %s719_s9 }
  0xf8   : > { %s721_s10 = scalar_lea.hbm %s720_s9, 1  ;;  %p726_p4 = scmp.lt.s32.totalorder %s720_s9, %s1000_s3 }
  0xf9   : > { %v407_v41 = vpop.xlane.xlu0 %406  ;;  %p722_p1 = scmp.ne.s32.totalorder %s720_s9, %s721_s10  ;;  %p727_p5 = scmp.lt.s32.totalorder %s725_s23, %s721_s10 }
  0xfa   : > { %409 = vst [vmem:[%s237_s15] sm:$0x1] %v407_v41 }
  0xfb   : > { %p723_p2 = pnand %p722_p1, %p865_p9  ;;  %p728_p6 = por %p727_p5, %p726_p4 }
  0xfd   : > { %p724_p3 = pneg %p723_p2 }
  0xff   : > { %p729_p7 = pnand %p728_p6, %p724_p3 }
 0x101   : > { %732 = shalt.err (!%p729_p7)
}
 0x102   : > { %576 = dma.vmem_to_hbm [thread:$0]  (%p865_p9), %s439_s4, 16, %s441_s5, %s415_s6  }
 0x103 PF: > { %s452_s11 = sand.u32 1, %s771_s12   ;;  %p584_p8 = pnand %p563_p12, %p872_p11 }
 0x104   : > { %s453_s18 = scalar_lea.sflag [#allocation6], %s452_s11 }
 0x105   : > { %p585_p10 = pneg %p584_p8 }
 0x107   : > { %762 = dma.done.wait (%p585_p10), %s453_s18, 16  }
 0x108   : > { %764 = vsyncadd (%p585_p10), %s453_s18, 4294967280  ;;  %s462_s19 = scalar_lea.sflag [#allocation9], %s452_s11 }
 0x109   : > { %766 = dma.done.wait (%p585_p10), %s462_s19, 16  }
 0x10a   : > { %768 = vsyncadd (%p585_p10), %s462_s19, 4294967280  ;;  %s23_s17 = sadd.s32 1, %s791_s17   ;;  %s1007_s12 = smov %s775_s13 }
 0x10b   : > { %p20_p13 = scmp.ge.s32.totalorder %s23_s17, 4   ;;  %s1008_s13 = smov %s779_s14 }
 0x10c   : > { %s1009_s14 = smov %s870_s26  ;;  %s1010_s15 = smov %s787_s16 }
 0x10d   : > { %s1011_s16 = smov %s1013_s20  ;;  %22 = sbr.rel (!%p20_p13) target bundleno = 8 (0x8), region = 101 }
 0x112   :  { %467 = vsyncpa [#allocation5], 1 }
 0x113   :  { %469 = vsyncpa [#allocation5 + $0x1], 1 }
 0x114   :  { %470 = vsyncpa [#allocation6], 1 }
 0x115   :  { %472 = vsyncpa [#allocation6 + $0x1], 1 }
 0x116   :  { %473 = vsyncpa [#allocation9], 1 }
 0x117   :  { %475 = vsyncpa [#allocation9 + $0x1], 1 }

</bundles_post_ra>
